<compile_context>
chip_gen: v7x
topology: tpu7x:2x2x1
jax: 0.10.0
libtpu: 0.0.40
codegen_flags: <defaults>
</compile_context>

<pallas_src>
import math
from functools import partial

import jax
import jax.numpy as jnp
from jax import lax
from jax.experimental import pallas as pl
from jax.experimental.pallas import tpu as pltpu

IGNORE = -100000.0  # matches the module's registered IGNORE buffer


def _pick_tile(s, target=256):
    """Largest power-of-two-ish tile <= target that divides s (full axis if s small)."""
    if s <= target:
        return s
    t = target
    while t > 8 and s % t != 0:
        t //= 2
    return t if s % t == 0 else s


def _pick_vmem_limit():
    try:
        cap = pltpu.get_tpu_info().vmem_capacity_bytes
    except Exception:
        cap = 64 * 1024 * 1024
    # Leave headroom below physical capacity (v7x has only 64 MiB per core).
    return int(min(cap * 3 // 4, 96 * 1024 * 1024))


# ----------------------------------------------------------------------------
# Kernel 1: fused K/V projection, head-major output (B, N, S, H)
# ----------------------------------------------------------------------------
def _kv_proj_kernel(x_ref, wk_ref, wv_ref, bk_ref, bv_ref, k_ref, v_ref,
                    *, n_heads, d_head):
    x = x_ref[0]                                            # (TP, E)
    k = jnp.dot(x, wk_ref[...], preferred_element_type=jnp.float32) + bk_ref[...]
    v = jnp.dot(x, wv_ref[...], preferred_element_type=jnp.float32) + bv_ref[...]
    k = k.astype(k_ref.dtype)
    v = v.astype(v_ref.dtype)
    # One head-major relayout per projection tile (N static lane-offset slices),
    # so the attention kernel never touches lane-misaligned per-head data.
    for n in range(n_heads):
        sl = slice(n * d_head, (n + 1) * d_head)
        k_ref[0, n] = k[:, sl]
        v_ref[0, n] = v[:, sl]


# ----------------------------------------------------------------------------
# Kernel 2: fused Q projection + flash attention (online softmax over KV tiles)
#           + wide output projection
# ----------------------------------------------------------------------------
def _flash_attn_kernel(x_ref, wq_ref, bq_ref, k_ref, v_ref, wo_ref, bo_ref,
                       o_ref, q_scr, m_scr, l_scr, acc_scr,
                       *, n_heads, d_head, tq, tk, approx_recip):
    qi = pl.program_id(1)
    ki = pl.program_id(2)

    @pl.when(ki == 0)
    def _init():
        # Q projection for this q tile, computed exactly once (x/wq/bq blocks are
        # resident across the kv axis).  1/sqrt(d_head) is pre-folded into wq/bq.
        q = jnp.dot(x_ref[0], wq_ref[...],
                    preferred_element_type=jnp.float32) + bq_ref[...]
        q = q.astype(q_scr.dtype)
        for n in range(n_heads):                            # head-major, once per q tile
            q_scr[n] = q[:, n * d_head:(n + 1) * d_head]
        m_scr[...] = jnp.full_like(m_scr, -jnp.inf)
        l_scr[...] = jnp.zeros_like(l_scr)
        acc_scr[...] = jnp.zeros_like(acc_scr)

    q0 = qi * tq
    k0 = ki * tk

    # Causal block skipping: this kv tile lies entirely in the masked upper triangle.
    @pl.when(k0 <= q0 + tq - 1)
    def _update():
        # Per-tile causal mask only (tiny), built once and broadcast over heads.
        row = lax.broadcasted_iota(jnp.int32, (tq, tk), 0)
        col = lax.broadcasted_iota(jnp.int32, (tq, tk), 1)
        causal = (k0 + col) > (q0 + row)                    # strictly-upper-triangular

        # All heads at once: batched MXU matmuls, f32 accumulation.
        s = jnp.einsum('nqh,nkh->nqk', q_scr[...], k_ref[0],
                       preferred_element_type=jnp.float32)  # (N, TQ, TK)
        s = jnp.where(causal[None], jnp.float32(IGNORE), s)

        m_prev = m_scr[...]                                  # (N, TQ, 1)
        m_new = jnp.maximum(m_prev, jnp.max(s, axis=-1, keepdims=True))
        alpha = jnp.exp(m_prev - m_new)
        p = jnp.exp(s - m_new)
        l_scr[...] = alpha * l_scr[...] + jnp.sum(p, axis=-1, keepdims=True)
        acc_scr[...] = alpha * acc_scr[...] + jnp.einsum(
            'nqk,nkh->nqh', p.astype(v_ref.dtype), v_ref[0],
            preferred_element_type=jnp.float32)
        m_scr[...] = m_new

    @pl.when(ki == pl.num_programs(2) - 1)
    def _finalize():
        inv_l = pl.reciprocal(l_scr[...], approx=approx_recip)   # (N, TQ, 1)
        z = acc_scr[...] * inv_l                                  # (N, TQ, H) f32
        # Single relayout point per q tile: head-major -> (TQ, N*H) slab feeding the
        # wide W_O matmul (contraction N*H, MXU-native depth in real GPT configs).
        z_slab = jnp.concatenate([z[n] for n in range(n_heads)], axis=-1)
        out = jnp.dot(z_slab.astype(wo_ref.dtype), wo_ref[...],
                      preferred_element_type=jnp.float32) + bo_ref[...]
        o_ref[0] = out.astype(o_ref.dtype)


# ----------------------------------------------------------------------------
# Host wrapper
# ----------------------------------------------------------------------------
def attention_forward(x, W_Q, W_K, W_V, W_O, b_Q, b_K, b_V, b_O,
                      compute_dtype=jnp.bfloat16, tq=None, tk=None, tp=None):
    B, S, E = x.shape
    N, _, H = W_Q.shape
    NH = N * H
    out_dtype = x.dtype

    tp = _pick_tile(S) if tp is None else tp
    tq = _pick_tile(S) if tq is None else tq
    tk = _pick_tile(S) if tk is None else tk
    assert S % tp == 0 and S % tq == 0 and S % tk == 0

    # Host-side head fusion, scale folding, and cast to the MXU compute dtype.
    scale = 1.0 / math.sqrt(H)
    xc = x.astype(compute_dtype)
    wq = (W_Q.transpose(1, 0, 2).reshape(E, NH) * scale).astype(compute_dtype)
    wk = W_K.transpose(1, 0, 2).reshape(E, NH).astype(compute_dtype)
    wv = W_V.transpose(1, 0, 2).reshape(E, NH).astype(compute_dtype)
    wo = W_O.reshape(NH, E).astype(compute_dtype)
    bq = (b_Q.reshape(1, NH) * scale).astype(jnp.float32)
    bk = b_K.reshape(1, NH).astype(jnp.float32)
    bv = b_V.reshape(1, NH).astype(jnp.float32)
    bo = b_O.reshape(1, E).astype(jnp.float32)

    ci = jnp.dtype(compute_dtype).itemsize
    vmem_limit = _pick_vmem_limit()

    # ---- kernel 1: fused K/V projection, head-major intermediates --------------
    kv_cost = pl.CostEstimate(
        flops=int(2 * 2 * B * S * E * NH),
        transcendentals=0,
        bytes_accessed=int(B * S * E * ci + 2 * E * NH * ci + 2 * NH * 4
                           + 2 * B * S * NH * ci),
    )
    k_hm, v_hm = pl.pallas_call(
        partial(_kv_proj_kernel, n_heads=N, d_head=H),
        out_shape=(jax.ShapeDtypeStruct((B, N, S, H), compute_dtype),
                   jax.ShapeDtypeStruct((B, N, S, H), compute_dtype)),
        grid_spec=pltpu.PrefetchScalarGridSpec(
            num_scalar_prefetch=0,
            grid=(B, S // tp),
            in_specs=[
                pl.BlockSpec((1, tp, E), lambda b, p: (b, p, 0)),
                pl.BlockSpec((E, NH), lambda b, p: (0, 0), pipeline_mode=pl.Buffered(1)),
                pl.BlockSpec((E, NH), lambda b, p: (0, 0), pipeline_mode=pl.Buffered(1)),
                pl.BlockSpec((1, NH), lambda b, p: (0, 0), pipeline_mode=pl.Buffered(1)),
                pl.BlockSpec((1, NH), lambda b, p: (0, 0), pipeline_mode=pl.Buffered(1)),
            ],
            out_specs=(
                pl.BlockSpec((1, N, tp, H), lambda b, p: (b, 0, p, 0)),
                pl.BlockSpec((1, N, tp, H), lambda b, p: (b, 0, p, 0)),
            ),
        ),
        compiler_params=pltpu.CompilerParams(
            dimension_semantics=("parallel", "parallel"),
            vmem_limit_bytes=vmem_limit),
        cost_estimate=kv_cost,
    )(xc, wk, wv, bk, bv)

    # ---- kernel 2: flash attention + output projection --------------------------
    approx_recip = bool(jnp.dtype(compute_dtype) != jnp.dtype(jnp.float32))
    attn_cost = pl.CostEstimate(
        flops=int(2 * B * S * E * NH            # Q projection
                  + 2 * B * N * S * S * H       # QK^T + PV (causal ~ half of 2x)
                  + 2 * B * S * NH * E),        # output projection
        transcendentals=int(B * N * S * S // 2),
        bytes_accessed=int(B * S * E * ci + 2 * E * NH * ci
                           + 2 * B * S * NH * ci * (S // tq)
                           + B * S * E * jnp.dtype(out_dtype).itemsize),
    )
    out = pl.pallas_call(
        partial(_flash_attn_kernel, n_heads=N, d_head=H, tq=tq, tk=tk,
                approx_recip=approx_recip),
        out_shape=jax.ShapeDtypeStruct((B, S, E), out_dtype),
        grid_spec=pltpu.PrefetchScalarGridSpec(
            num_scalar_prefetch=0,
            grid=(B, S // tq, S // tk),
            in_specs=[
                pl.BlockSpec((1, tq, E), lambda b, q, k: (b, q, 0)),   # x (q rows)
                pl.BlockSpec((E, NH), lambda b, q, k: (0, 0), pipeline_mode=pl.Buffered(1)),
                pl.BlockSpec((1, NH), lambda b, q, k: (0, 0), pipeline_mode=pl.Buffered(1)),
                pl.BlockSpec((1, N, tk, H), lambda b, q, k: (b, 0, k, 0)),  # K tile
                pl.BlockSpec((1, N, tk, H), lambda b, q, k: (b, 0, k, 0)),  # V tile
                pl.BlockSpec((NH, E), lambda b, q, k: (0, 0), pipeline_mode=pl.Buffered(1)),
                pl.BlockSpec((1, E), lambda b, q, k: (0, 0), pipeline_mode=pl.Buffered(1)),
            ],
            out_specs=pl.BlockSpec((1, tq, E), lambda b, q, k: (b, q, 0)),
            scratch_shapes=[
                pltpu.VMEM((N, tq, H), compute_dtype),   # head-major Q slab
                pltpu.VMEM((N, tq, 1), jnp.float32),     # running max
                pltpu.VMEM((N, tq, 1), jnp.float32),     # running denominator
                pltpu.VMEM((N, tq, H), jnp.float32),     # unnormalized PV accumulator
            ],
        ),
        compiler_params=pltpu.CompilerParams(
            dimension_semantics=("parallel", "parallel", "arbitrary"),
            vmem_limit_bytes=vmem_limit),
        cost_estimate=attn_cost,
    )(xc, wq, bq, k_hm, v_hm, wo, bo)
    return out


def attention_reference(x, W_Q, W_K, W_V, W_O, b_Q, b_K, b_V, b_O):
    """Pure-JAX f32 reference matching the PyTorch forward exactly."""
    Q = jnp.einsum('bse,neh->bsnh', x, W_Q) + b_Q
    K = jnp.einsum('bse,neh->bsnh', x, W_K) + b_K
    V = jnp.einsum('bse,neh->bsnh', x, W_V) + b_V
    scores = jnp.einsum('bqnh,bknh->bnqk', Q, K) / math.sqrt(W_Q.shape[-1])
    S = scores.shape[-1]
    mask = jnp.triu(jnp.ones((S, S), dtype=bool), k=1)
    scores = jnp.where(mask, IGNORE, scores)
    probs = jax.nn.softmax(scores, axis=-1)
    z = jnp.einsum('bnqk,bknh->bqnh', probs, V)
    return jnp.einsum('bqnh,nhe->bqe', z, W_O) + b_O


if __name__ == "__main__":
    # Small synthetic config: batch=2, seq=16, d_model=32, n_heads=4, d_head=8
    B, S, E, N, H = 2, 16, 32, 4, 8

    key = jax.random.PRNGKey(0)
    kx, kq, kk, kv, ko, kbq, kbk, kbv, kbo = jax.random.split(key, 9)

    x = jax.random.normal(kx, (B, S, E), dtype=jnp.float32)
    W_Q = 0.1 * jax.random.normal(kq, (N, E, H), dtype=jnp.float32)
    W_K = 0.1 * jax.random.normal(kk, (N, E, H), dtype=jnp.float32)
    W_V = 0.1 * jax.random.normal(kv, (N, E, H), dtype=jnp.float32)
    W_O = 0.1 * jax.random.normal(ko, (N, H, E), dtype=jnp.float32)
    b_Q = 0.05 * jax.random.normal(kbq, (N, H), dtype=jnp.float32)
    b_K = 0.05 * jax.random.normal(kbk, (N, H), dtype=jnp.float32)
    b_V = 0.05 * jax.random.normal(kbv, (N, H), dtype=jnp.float32)
    b_O = 0.05 * jax.random.normal(kbo, (E,), dtype=jnp.float32)

    ref = attention_reference(x, W_Q, W_K, W_V, W_O, b_Q, b_K, b_V, b_O)

    # f32 compute path, single-tile (tight tolerance, exact reciprocal).
    out_f32 = attention_forward(x, W_Q, W_K, W_V, W_O, b_Q, b_K, b_V, b_O,
                                compute_dtype=jnp.float32)
    out_f32 = jax.block_until_ready(out_f32)
    assert out_f32.shape == (B, S, E) and out_f32.dtype == x.dtype
    assert jnp.allclose(out_f32, ref, atol=1e-4, rtol=1e-4), "f32 mismatch vs reference"

    # f32 compute path, multi-tile flash (exercises online softmax across KV tiles
    # and causal block skipping: 2 q tiles x 2 kv tiles).
    out_f32_t = attention_forward(x, W_Q, W_K, W_V, W_O, b_Q, b_K, b_V, b_O,
                                  compute_dtype=jnp.float32, tq=8, tk=8, tp=8)
    out_f32_t = jax.block_until_ready(out_f32_t)
    assert jnp.allclose(out_f32_t, ref, atol=1e-4, rtol=1e-4), "tiled f32 mismatch"

    # Default bf16 MXU compute path (f32 accumulation / softmax; looser tolerance).
    out_bf16 = attention_forward(x, W_Q, W_K, W_V, W_O, b_Q, b_K, b_V, b_O)
    out_bf16 = jax.block_until_ready(out_bf16)
    assert out_bf16.shape == (B, S, E)
    assert jnp.allclose(out_bf16, ref, atol=2e-2, rtol=2e-2), "bf16 mismatch vs reference"

    print("KERNEL_OK")
</pallas_src>

<mosaic_0001>
module attributes {stable_mosaic.version = 11 : i64} {
  func.func @_kv_proj_kernel(%arg0: i32, %arg1: i32, %arg2: memref<1x16x32xf32, #tpu.memory_space<vmem>>, %arg3: memref<32x32xf32, #tpu.memory_space<vmem>>, %arg4: memref<32x32xf32, #tpu.memory_space<vmem>>, %arg5: memref<1x32xf32, #tpu.memory_space<vmem>>, %arg6: memref<1x32xf32, #tpu.memory_space<vmem>>, %arg7: memref<1x4x16x8xf32, #tpu.memory_space<vmem>>, %arg8: memref<1x4x16x8xf32, #tpu.memory_space<vmem>>) attributes {dimension_semantics = [#tpu.dimension_semantics<parallel>, #tpu.dimension_semantics<parallel>], iteration_bounds = array<i64: 2, 1>, scalar_prefetch = 0 : i64, scratch_operands = 0 : i64, tpu.core_type = #tpu.core_type<tc>, window_params = [{transform_indices = @transform_0, window_bounds = array<i64: 1, 16, 32>}, {pipeline_mode = #tpu.pipeline_mode<synchronous>, transform_indices = @transform_1, window_bounds = array<i64: 32, 32>}, {pipeline_mode = #tpu.pipeline_mode<synchronous>, transform_indices = @transform_2, window_bounds = array<i64: 32, 32>}, {pipeline_mode = #tpu.pipeline_mode<synchronous>, transform_indices = @transform_3, window_bounds = array<i64: 1, 32>}, {pipeline_mode = #tpu.pipeline_mode<synchronous>, transform_indices = @transform_4, window_bounds = array<i64: 1, 32>}, {transform_indices = @transform_5, window_bounds = array<i64: 1, 4, 16, 8>}, {transform_indices = @transform_6, window_bounds = array<i64: 1, 4, 16, 8>}]} {
    %c0 = arith.constant 0 : index
    %c0_0 = arith.constant 0 : index
    %c0_1 = arith.constant 0 : index
    %0 = vector.load %arg2[%c0, %c0_0, %c0_1] : memref<1x16x32xf32, #tpu.memory_space<vmem>>, vector<1x16x32xf32>
    %1 = vector.shape_cast %0 : vector<1x16x32xf32> to vector<16x32xf32>
    %c0_2 = arith.constant 0 : index
    %c0_3 = arith.constant 0 : index
    %2 = vector.load %arg3[%c0_2, %c0_3] : memref<32x32xf32, #tpu.memory_space<vmem>>, vector<32x32xf32>
    %cst = arith.constant dense<0.000000e+00> : vector<16x32xf32>
    %3 = tpu.matmul %1, %2, %cst {dimension_numbers = #tpu.dot_dimension_numbers<[1], [0], [0], [1], [0, 0, 1, 1], [], []>} : vector<16x32xf32>, vector<32x32xf32>, vector<16x32xf32> -> vector<16x32xf32>
    %c0_4 = arith.constant 0 : index
    %c0_5 = arith.constant 0 : index
    %4 = vector.load %arg5[%c0_4, %c0_5] : memref<1x32xf32, #tpu.memory_space<vmem>>, vector<1x32xf32>
    %5 = vector.broadcast %4 : vector<1x32xf32> to vector<16x32xf32>
    %6 = arith.addf %3, %5 : vector<16x32xf32>
    %c0_6 = arith.constant 0 : index
    %c0_7 = arith.constant 0 : index
    %7 = vector.load %arg4[%c0_6, %c0_7] : memref<32x32xf32, #tpu.memory_space<vmem>>, vector<32x32xf32>
    %cst_8 = arith.constant dense<0.000000e+00> : vector<16x32xf32>
    %8 = tpu.matmul %1, %7, %cst_8 {dimension_numbers = #tpu.dot_dimension_numbers<[1], [0], [0], [1], [0, 0, 1, 1], [], []>} : vector<16x32xf32>, vector<32x32xf32>, vector<16x32xf32> -> vector<16x32xf32>
    %c0_9 = arith.constant 0 : index
    %c0_10 = arith.constant 0 : index
    %9 = vector.load %arg6[%c0_9, %c0_10] : memref<1x32xf32, #tpu.memory_space<vmem>>, vector<1x32xf32>
    %10 = vector.broadcast %9 : vector<1x32xf32> to vector<16x32xf32>
    %11 = arith.addf %8, %10 : vector<16x32xf32>
    %12 = vector.extract_strided_slice %6 {offsets = [0, 0], sizes = [16, 8], strides = [1, 1]} : vector<16x32xf32> to vector<16x8xf32>
    %c0_11 = arith.constant 0 : index
    %c0_12 = arith.constant 0 : index
    %c0_13 = arith.constant 0 : index
    %c0_14 = arith.constant 0 : index
    %13 = vector.load %arg7[%c0_11, %c0_12, %c0_13, %c0_14] : memref<1x4x16x8xf32, #tpu.memory_space<vmem>>, vector<1x1x16x8xf32>
    %14 = vector.shape_cast %13 : vector<1x1x16x8xf32> to vector<16x8xf32>
    %15 = vector.shape_cast %12 : vector<16x8xf32> to vector<1x1x16x8xf32>
    tpu.vector_store %arg7[%c0_11, %c0_12, %c0_13, %c0_14], %15 {strides = array<i32>} : memref<1x4x16x8xf32, #tpu.memory_space<vmem>>, vector<1x1x16x8xf32>,
    %16 = vector.extract_strided_slice %11 {offsets = [0, 0], sizes = [16, 8], strides = [1, 1]} : vector<16x32xf32> to vector<16x8xf32>
    %c0_15 = arith.constant 0 : index
    %c0_16 = arith.constant 0 : index
    %c0_17 = arith.constant 0 : index
    %c0_18 = arith.constant 0 : index
    %17 = vector.load %arg8[%c0_15, %c0_16, %c0_17, %c0_18] : memref<1x4x16x8xf32, #tpu.memory_space<vmem>>, vector<1x1x16x8xf32>
    %18 = vector.shape_cast %17 : vector<1x1x16x8xf32> to vector<16x8xf32>
    %19 = vector.shape_cast %16 : vector<16x8xf32> to vector<1x1x16x8xf32>
    tpu.vector_store %arg8[%c0_15, %c0_16, %c0_17, %c0_18], %19 {strides = array<i32>} : memref<1x4x16x8xf32, #tpu.memory_space<vmem>>, vector<1x1x16x8xf32>,
    %20 = vector.extract_strided_slice %6 {offsets = [0, 8], sizes = [16, 8], strides = [1, 1]} : vector<16x32xf32> to vector<16x8xf32>
    %c0_19 = arith.constant 0 : index
    %c1 = arith.constant 1 : index
    %c0_20 = arith.constant 0 : index
    %c0_21 = arith.constant 0 : index
    %21 = vector.load %arg7[%c0_19, %c1, %c0_20, %c0_21] : memref<1x4x16x8xf32, #tpu.memory_space<vmem>>, vector<1x1x16x8xf32>
    %22 = vector.shape_cast %21 : vector<1x1x16x8xf32> to vector<16x8xf32>
    %23 = vector.shape_cast %20 : vector<16x8xf32> to vector<1x1x16x8xf32>
    tpu.vector_store %arg7[%c0_19, %c1, %c0_20, %c0_21], %23 {strides = array<i32>} : memref<1x4x16x8xf32, #tpu.memory_space<vmem>>, vector<1x1x16x8xf32>,
    %24 = vector.extract_strided_slice %11 {offsets = [0, 8], sizes = [16, 8], strides = [1, 1]} : vector<16x32xf32> to vector<16x8xf32>
    %c0_22 = arith.constant 0 : index
    %c1_23 = arith.constant 1 : index
    %c0_24 = arith.constant 0 : index
    %c0_25 = arith.constant 0 : index
    %25 = vector.load %arg8[%c0_22, %c1_23, %c0_24, %c0_25] : memref<1x4x16x8xf32, #tpu.memory_space<vmem>>, vector<1x1x16x8xf32>
    %26 = vector.shape_cast %25 : vector<1x1x16x8xf32> to vector<16x8xf32>
    %27 = vector.shape_cast %24 : vector<16x8xf32> to vector<1x1x16x8xf32>
    tpu.vector_store %arg8[%c0_22, %c1_23, %c0_24, %c0_25], %27 {strides = array<i32>} : memref<1x4x16x8xf32, #tpu.memory_space<vmem>>, vector<1x1x16x8xf32>,
    %28 = vector.extract_strided_slice %6 {offsets = [0, 16], sizes = [16, 8], strides = [1, 1]} : vector<16x32xf32> to vector<16x8xf32>
    %c0_26 = arith.constant 0 : index
    %c2 = arith.constant 2 : index
    %c0_27 = arith.constant 0 : index
    %c0_28 = arith.constant 0 : index
    %29 = vector.load %arg7[%c0_26, %c2, %c0_27, %c0_28] : memref<1x4x16x8xf32, #tpu.memory_space<vmem>>, vector<1x1x16x8xf32>
    %30 = vector.shape_cast %29 : vector<1x1x16x8xf32> to vector<16x8xf32>
    %31 = vector.shape_cast %28 : vector<16x8xf32> to vector<1x1x16x8xf32>
    tpu.vector_store %arg7[%c0_26, %c2, %c0_27, %c0_28], %31 {strides = array<i32>} : memref<1x4x16x8xf32, #tpu.memory_space<vmem>>, vector<1x1x16x8xf32>,
    %32 = vector.extract_strided_slice %11 {offsets = [0, 16], sizes = [16, 8], strides = [1, 1]} : vector<16x32xf32> to vector<16x8xf32>
    %c0_29 = arith.constant 0 : index
    %c2_30 = arith.constant 2 : index
    %c0_31 = arith.constant 0 : index
    %c0_32 = arith.constant 0 : index
    %33 = vector.load %arg8[%c0_29, %c2_30, %c0_31, %c0_32] : memref<1x4x16x8xf32, #tpu.memory_space<vmem>>, vector<1x1x16x8xf32>
    %34 = vector.shape_cast %33 : vector<1x1x16x8xf32> to vector<16x8xf32>
    %35 = vector.shape_cast %32 : vector<16x8xf32> to vector<1x1x16x8xf32>
    tpu.vector_store %arg8[%c0_29, %c2_30, %c0_31, %c0_32], %35 {strides = array<i32>} : memref<1x4x16x8xf32, #tpu.memory_space<vmem>>, vector<1x1x16x8xf32>,
    %36 = vector.extract_strided_slice %6 {offsets = [0, 24], sizes = [16, 8], strides = [1, 1]} : vector<16x32xf32> to vector<16x8xf32>
    %c0_33 = arith.constant 0 : index
    %c3 = arith.constant 3 : index
    %c0_34 = arith.constant 0 : index
    %c0_35 = arith.constant 0 : index
    %37 = vector.load %arg7[%c0_33, %c3, %c0_34, %c0_35] : memref<1x4x16x8xf32, #tpu.memory_space<vmem>>, vector<1x1x16x8xf32>
    %38 = vector.shape_cast %37 : vector<1x1x16x8xf32> to vector<16x8xf32>
    %39 = vector.shape_cast %36 : vector<16x8xf32> to vector<1x1x16x8xf32>
    tpu.vector_store %arg7[%c0_33, %c3, %c0_34, %c0_35], %39 {strides = array<i32>} : memref<1x4x16x8xf32, #tpu.memory_space<vmem>>, vector<1x1x16x8xf32>,
    %40 = vector.extract_strided_slice %11 {offsets = [0, 24], sizes = [16, 8], strides = [1, 1]} : vector<16x32xf32> to vector<16x8xf32>
    %c0_36 = arith.constant 0 : index
    %c3_37 = arith.constant 3 : index
    %c0_38 = arith.constant 0 : index
    %c0_39 = arith.constant 0 : index
    %41 = vector.load %arg8[%c0_36, %c3_37, %c0_38, %c0_39] : memref<1x4x16x8xf32, #tpu.memory_space<vmem>>, vector<1x1x16x8xf32>
    %42 = vector.shape_cast %41 : vector<1x1x16x8xf32> to vector<16x8xf32>
    %43 = vector.shape_cast %40 : vector<16x8xf32> to vector<1x1x16x8xf32>
    tpu.vector_store %arg8[%c0_36, %c3_37, %c0_38, %c0_39], %43 {strides = array<i32>} : memref<1x4x16x8xf32, #tpu.memory_space<vmem>>, vector<1x1x16x8xf32>,
    return
  }
  func.func @transform_0(%arg0: i32, %arg1: i32) -> (i32, i32, i32) {
    %c0_i32 = arith.constant 0 : i32
    %c0_i32_0 = arith.constant 0 : i32
    return %arg0, %arg1, %c0_i32 : i32, i32, i32
  }
  func.func @transform_1(%arg0: i32, %arg1: i32) -> (i32, i32) {
    %c0_i32 = arith.constant 0 : i32
    %c0_i32_0 = arith.constant 0 : i32
    %c0_i32_1 = arith.constant 0 : i32
    return %c0_i32, %c0_i32_0 : i32, i32
  }
  func.func @transform_2(%arg0: i32, %arg1: i32) -> (i32, i32) {
    %c0_i32 = arith.constant 0 : i32
    %c0_i32_0 = arith.constant 0 : i32
    %c0_i32_1 = arith.constant 0 : i32
    return %c0_i32, %c0_i32_0 : i32, i32
  }
  func.func @transform_3(%arg0: i32, %arg1: i32) -> (i32, i32) {
    %c0_i32 = arith.constant 0 : i32
    %c0_i32_0 = arith.constant 0 : i32
    %c0_i32_1 = arith.constant 0 : i32
    return %c0_i32, %c0_i32_0 : i32, i32
  }
  func.func @transform_4(%arg0: i32, %arg1: i32) -> (i32, i32) {
    %c0_i32 = arith.constant 0 : i32
    %c0_i32_0 = arith.constant 0 : i32
    %c0_i32_1 = arith.constant 0 : i32
    return %c0_i32, %c0_i32_0 : i32, i32
  }
  func.func @transform_5(%arg0: i32, %arg1: i32) -> (i32, i32, i32, i32) {
    %c0_i32 = arith.constant 0 : i32
    %c0_i32_0 = arith.constant 0 : i32
    %c0_i32_1 = arith.constant 0 : i32
    return %arg0, %c0_i32, %arg1, %c0_i32_0 : i32, i32, i32, i32
  }
  func.func @transform_6(%arg0: i32, %arg1: i32) -> (i32, i32, i32, i32) {
    %c0_i32 = arith.constant 0 : i32
    %c0_i32_0 = arith.constant 0 : i32
    %c0_i32_1 = arith.constant 0 : i32
    return %arg0, %c0_i32, %arg1, %c0_i32_0 : i32, i32, i32, i32
  }
}

</mosaic_0001>

<bundles_post_ra>
// kernel: tpu_custom_call.1
= control target key start
LH: loop header
LB: loop body
LE: loop exit
PB: predicated region body
PF: predicated region fallthrough
CT: control target
= control target key end

     0   :  { %12 = vsyncpa [#allocation3], 0  ;;  %s1371_s0 = inlined_call_operand.hbm [shape: f32[2,16,32], index: 0, kind: input, shape index: {}]   ;;  %s1372_s1 = inlined_call_operand.hbm [shape: f32[32,32], index: 1, kind: input, shape index: {}]   ;;  %s1373_s2 = inlined_call_operand.hbm [shape: f32[32,32], index: 2, kind: input, shape index: {}]   ;;  %s1374_s3 = inlined_call_operand.vmem [shape: f32[1,32], index: 3, kind: input, shape index: {}]   ;;  %s1375_s4 = inlined_call_operand.vmem [shape: f32[1,32], index: 4, kind: input, shape index: {}]   ;;  %s1376_s5 = inlined_call_operand.vmem [shape: f32[2,4,16,8], index: 5, kind: output, shape index: {0}]   ;;  %s1377_s6 = inlined_call_operand.vmem [shape: f32[2,4,16,8], index: 6, kind: output, shape index: {1}]  }
   0x1   :  { %14 = vsyncpa [#allocation3 + $0x1], 0 }
   0x2   :  { %15 = vsyncpa [#allocation5], 0  ;;  %s1117_s21 = smov 0   ;;  %s1119_s22 = smov 0  }
   0x3   :  { %s1121_s23 = smov 0   ;;  %s1123_s24 = smov 0  }
   0x4   :  { %s1125_s25 = smov 0   ;;  %s1127_s26 = smov 0  }
   0x5 LB: > { %s761_s27 = sadd.s32 4294967295, %s1072_s26   ;;  %p55_p0 = scmp.ne.s32.totalorder %s1056_s22, %s1052_s21  ;;  %s1072_s26 = sphi %s1127_s26, %s21_s26   ;;  %s1068_s25 = sphi %s1125_s25, %s1394_s25   ;;  %s1064_s24 = sphi %s1123_s24, %s1393_s24   ;;  %s1060_s23 = sphi %s1121_s23, %s1392_s23   ;;  %s1056_s22 = sphi %s1119_s22, %s1391_s22   ;;  %s1052_s21 = sphi %s1117_s21, %s1390_s21  }
   0x6   : > { %p1147_p1 = scmp.eq.s32.totalorder %s761_s27, 0  ;;  %p763_p2 = scmp.ge.s32.totalorder %s1072_s26, 1 }
   0x7   : > { %p206_p3 = scmp.lt.s32.totalorder %s1072_s26, 3  ;;  %s1074_s7 = smov [#allocation4]  }
   0x8   : > { %s1382_s28 = scalar_select %p1147_p1, 1, 0 }
   0x9   : > { %p1155_p4 = por %p1147_p1, %p55_p0  ;;  %p1159_p5 = pnand %p763_p2, %p206_p3 }
   0xa   : > { %s218_s8 = sshll.u32 %s1074_s7, 4  ;;  %s1075_s10 = smov [#allocation6]   ;;  %s219_s8 = int_to_ptr.vmem [resolvable:$true] %s218_s8 }
   0xb   : > { %s1383_s29 = scalar_select %p1155_p4, 1, 0 }
   0xc   : > { %s1384_s30 = scalar_select %p1159_p5, 1, 0 }
   0xd   : > { %p861_p6 = pneg %p1159_p5  ;;  %s231_s11 = sshll.u32 %s1075_s10, 4  ;;  %s1171_s11 = int_to_ptr.vmem [resolvable:$true] %s231_s11 }
   0xe   : > { %s932_s14 = scalar_lea.hbm %s1372_s1, 512 }
   0xf   : > { %p1167_p7 = pnand %p861_p6, %p1147_p1  ;;  %p933_p8 = scmp.ne.s32.totalorder %s1372_s1, %s932_s14 }
  0x10   : > { %p939_p12 = scmp.lt.u32.totalorder %s932_s14, %s1372_s1 }
  0x11   : > { %p934_p9 = pneg %p1167_p7 }
  0x13   : > { %p935_p10 = pnand %p934_p9, %p933_p8 }
  0x15   : > { %p936_p11 = pneg %p935_p10 }
  0x17   : > { %p941_p13 = pnand %p939_p12, %p936_p11 }
  0x19   : > { %944 = shalt.err (!%p941_p13)
}
  0x1a   : > { %s945_s19 = scalar_lea.vmem %s219_s8, 512  ;;  %p953_p6 = scmp.lt.s32.totalorder %s219_s8, %s219_s8 }
  0x1b   : > { %p946_p0 = scmp.ne.s32.totalorder %s219_s8, %s945_s19  ;;  %p954_p1 = scmp.lt.s32.totalorder %s945_s19, %s945_s19 }
  0x1d   : > { %p948_p2 = pnand %p946_p0, %p934_p9  ;;  %p955_p4 = por %p954_p1, %p953_p6 }
  0x1f   : > { %p949_p3 = pneg %p948_p2 }
  0x21   : > { %p956_p5 = pnand %p955_p4, %p949_p3 }
  0x23   : > { %959 = shalt.err (!%p956_p5)
}
  0x24   : > { %s1076_s20 = smov 128   ;;  %s1077_s21 = smov 8  }
  0x25   : > { %864 = dma.hbm_to_vmem [thread:$0]  (!%p1167_p7), %s1372_s1, 512, %s219_s8, [#allocation5], %s1076_s20, %s1076_s20, %s1077_s21  }
  0x26   : > { %s960_s13 = scalar_lea.hbm %s1373_s2, 512 }
  0x27   : > { %p961_p1 = scmp.ne.s32.totalorder %s1373_s2, %s960_s13  ;;  %p967_p8 = scmp.lt.u32.totalorder %s960_s13, %s1373_s2 }
  0x29   : > { %p963_p4 = pnand %p961_p1, %p934_p9 }
  0x2b   : > { %p964_p5 = pneg %p963_p4 }
  0x2d   : > { %p969_p10 = pnand %p967_p8, %p964_p5 }
  0x2f   : > { %972 = shalt.err (!%p969_p10)
}
  0x30   : > { %s973_s8 = scalar_lea.vmem %s1171_s11, 512  ;;  %p981_p0 = scmp.lt.s32.totalorder %s1171_s11, %s1171_s11 }
  0x31   : > { %p974_p11 = scmp.ne.s32.totalorder %s1171_s11, %s973_s8  ;;  %p982_p2 = scmp.lt.s32.totalorder %s973_s8, %s973_s8 }
  0x33   : > { %p976_p12 = pnand %p974_p11, %p934_p9  ;;  %p983_p3 = por %p982_p2, %p981_p0 }
  0x35   : > { %p977_p13 = pneg %p976_p12 }
  0x37   : > { %p984_p6 = pnand %p983_p3, %p977_p13 }
  0x39   : > { %987 = shalt.err (!%p984_p6)
}
  0x3a   : > { %867 = dma.hbm_to_vmem [thread:$0]  (!%p1167_p7), %s1373_s2, 512, %s1171_s11, [#allocation5], %s1076_s20, %s1076_s20, %s1077_s21  }
  0x3b   : > { %s33_s27 = sadd.s32 1, %s1068_s25  ;;  %s42_s9 = sadd.s32 1, %s1060_s23 }
  0x3c   : > { %p35_p9 = scmp.ge.s32.totalorder %s33_s27, 2  ;;  %p49_p1 = scmp.ne.s32.totalorder %s1060_s23, %s1056_s22 }
  0x3d   : > { %p50_p4 = scmp.eq.s32.totalorder %s1072_s26, 0  ;;  %p874_p5 = scmp.lt.s32.totalorder %s1072_s26, 2 }
  0x3e   : > { %s1396_s27 = smov (%p35_p9, %s33_s27), 0  ;;  %s251_s7 = sand.u32 1, %s1060_s23  }
  0x3f   : > { %p51_p8 = por %p50_p4, %p49_p1  ;;  %s37_s10 = ssub.s32 %s1068_s25, %s1396_s27 }
  0x40   : > { %p40_p10 = scmp.eq.s32.totalorder %s37_s10, 0  ;;  %s767_s12 = sshll.u32 %s251_s7, 4 }
  0x41   : > { %s798_s13 = sshll.u32 %s1068_s25, 8  ;;  %s255_s17 = scalar_lea.vmem [#allocation2], %s767_s12 }
  0x42   : > { %s1239_s14 = scalar_select %p40_p10, %s1060_s23, %s42_s9  }
  0x43   : > { %s1244_s16 = scalar_lea.hbm %s1371_s0, %s798_s13  ;;  %s264_s8 = sshll.u32 %s255_s17, 4  ;;  %s1246_s8 = int_to_ptr.vmem [resolvable:$true] %s264_s8 }
  0x44   : > { %p1250_p7 = pnand %p874_p5, %p51_p8  ;;  %s1254_s19 = scalar_lea.sflag [#allocation3], %s251_s7 }
  0x45   : > { %s988_s9 = scalar_lea.hbm %s1244_s16, 256  ;;  %s993_s13 = scalar_lea.hbm %s1371_s0, 512 }
  0x46   : > { %p989_p11 = scmp.ne.s32.totalorder %s1244_s16, %s988_s9  ;;  %p990_p12 = pneg %p1250_p7 }
  0x47   : > { %p994_p2 = scmp.lt.u32.totalorder %s1244_s16, %s1371_s0  ;;  %p995_p3 = scmp.lt.u32.totalorder %s993_s13, %s988_s9 }
  0x48   : > { %p991_p13 = pnand %p990_p12, %p989_p11  ;;  %p997_p9 = scmp.lt.u32.totalorder %s988_s9, %s1244_s16 }
  0x49   : > { %p996_p6 = por %p995_p3, %p994_p2 }
  0x4a   : > { %p992_p0 = pneg %p991_p13 }
  0x4b   : > { %p998_p1 = por %p997_p9, %p996_p6 }
  0x4d   : > { %p999_p4 = pnand %p998_p1, %p992_p0 }
  0x4f   : > { %1002 = shalt.err (!%p999_p4)
}
  0x50   : > { %s1003_s7 = scalar_lea.vmem %s1246_s8, 256  ;;  %s1078_s17 = smov [#allocation2]  }
  0x51   : > { %p1004_p5 = scmp.ne.s32.totalorder %s1246_s8, %s1003_s7  ;;  %s1008_s10 = sshll.u32 %s1078_s17, 4  ;;  %s1009_s10 = int_to_ptr.vmem [resolvable:$false] %s1008_s10 }
  0x52   : > { %s1010_s12 = scalar_lea.vmem %s1009_s10, 512  ;;  %p1011_p11 = scmp.lt.s32.totalorder %s1246_s8, %s1009_s10 }
  0x53   : > { %p1006_p8 = pnand %p1004_p5, %p990_p12  ;;  %p1012_p13 = scmp.lt.s32.totalorder %s1010_s12, %s1003_s7 }
  0x55   : > { %p1007_p10 = pneg %p1006_p8  ;;  %p1013_p2 = por %p1012_p13, %p1011_p11 }
  0x57   : > { %p1014_p3 = pnand %p1013_p2, %p1007_p10 }
  0x59   : > { %1017 = shalt.err (!%p1014_p3)
}
  0x5a   : > { %871 = dma.hbm_to_vmem [thread:$0]  (!%p1250_p7), %s1244_s16, 256, %s1246_s8, %s1254_s19, %s1076_s20, %s1076_s20, %s1077_s21  }
  0x5b   : > { %p1387_p12 = scmp.ne.s32.totalorder %s1384_s30, 0 }
  0x5c   : > { %s278_s9 = sand.u32 (!%p1387_p12), 1, %s1056_s22   ;;  %p1388_p0 = scmp.ne.s32.totalorder (!%p1387_p12), %s1383_s29, 0 }
  0x5d   : > { %276 = sbr.rel (%p1387_p12) target bundleno = 466 (0x1d2), region = 40  ;;  %s1288_s13 = sshll.u32 (!%p1387_p12), %s278_s9, 4 }
  0x5e   : > { %s279_s15 = scalar_lea.sflag (!%p1387_p12), [#allocation3], %s278_s9  ;;  %s282_s11 = scalar_lea.vmem (!%p1387_p12), [#allocation2], %s1288_s13 }
  0x64   : > { %1043 = dma.done.wait (%p1388_p0), %s279_s15, 256  }
  0x65   : > { %1045 = vsyncadd (%p1388_p0), %s279_s15, 4294967040  ;;  %p1389_p6 = scmp.ne.s32.totalorder %s1382_s28, 0 }
  0x67   : > { %1047 = dma.done.wait (%p1389_p6), [#allocation5], 1024  }
  0x68   : > { %1049 = vsyncadd (%p1389_p6), [#allocation5], 4294966272  ;;  %v355_v0 = vld [vmem:[#allocation4] sm:$0xff]  ;;  %v356_v1 = vld [vmem:[#allocation4 + $0x8] sm:$0xff]  ;;  %vm366_vm0 = vcmask 261120   ;;  %p334_p7 = scmp.lt.s32.totalorder %s1064_s24, 1 }
  0x69   : > { %v448_v2 = vld [vmem:[#allocation6] sm:$0xff]  ;;  %v835_v3 = vpack.c.bf16 %v356_v1, %v355_v0  ;;  %v449_v4 = vld [vmem:[#allocation6 + $0x8] sm:$0xff]  ;;  %v357_v5 = vld [vmem:[#allocation4 + $0x10] sm:$0xff]  ;;  %vm534_vm1 = vcmask 64512   ;;  %s1079_s17 = smov 120   ;;  %s1080_s10 = smov 112  }
  0x6a   : > { %v358_v6 = vld [vmem:[#allocation4 + $0x18] sm:$0xff]  ;;  %v843_v7 = vpack.c.bf16 %v449_v4, %v448_v2  ;;  %v450_v9 = vld [vmem:[#allocation6 + $0x10] sm:$0xff]  ;;  %s1398_s24 = smov (!%p334_p7, %s1064_s24), 1  ;;  %v778_v14 = vld [vmem:[%s1374_s3] ss:$0 sm:$0xff]  ;;  %s1081_s12 = smov 104  }
  0x6b   : > { %v839_v8 = vpack.c.bf16 %v358_v6, %v357_v5  ;;  %v451_v10 = vld [vmem:[#allocation6 + $0x18] sm:$0xff]  ;;  %v353_v11 = vld [vmem:[%s282_s11] sm:$0xff]  ;;  %836 = vmatprep.subr.bf16.mxu0 %v835_v3  ;;  %s799_s28 = sshll.u32 %s1398_s24, 6 }
  0x6c   : > { %v847_v12 = vpack.c.bf16 %v451_v10, %v450_v9  ;;  %821 = vmatprep.mubr.msk.f32.mxu0 %vm366_vm0, %v353_v11  ;;  %844 = vmatprep.subr.bf16.mxu1 %v843_v7  ;;  %v354_v13 = vld [vmem:[%s282_s11 + $0x8] sm:$0xff]  ;;  %v781_v15 = vld [vmem:[%s1375_s4] ss:$0 sm:$0xff]  ;;  %s1314_s18 = scalar_lea.vmem %s1376_s5, %s799_s28  ;;  %s1319_s7 = scalar_lea.vmem %s1377_s6, %s799_s28 }
  0x6d   : > { %838 = vmatpush3.bf16.msra.mxu0 %v835_v3  ;;  %846 = vmatpush3.bf16.msra.mxu1 %v843_v7 }
  0x6e   : > { %840 = vmatprep.subr.bf16.mxu0 %v839_v8  ;;  %848 = vmatprep.subr.bf16.mxu1 %v847_v12 }
  0x6f   : > { %832 = vmatprep.mubr.msk.f32.mxu1 %vm366_vm0, %v353_v11 }
  0x71   : > { %842 = vmatpush3.bf16.msra.mxu0 %v839_v8  ;;  %850 = vmatpush3.bf16.msra.mxu1 %v847_v12 }
  0x74   : > { %822 = vmatmul.mubr.msk.f32.vlgmr.msra.gmra.mrb[0].mxu0 %vm366_vm0, %v354_v13  ;;  %833 = vmatmul.mubr.msk.f32.vlgmr.msra.gmra.mrb[0].mxu1 %vm366_vm0, %v354_v13 }
 0x147   : > { %v823_v16 = vpop.f32.mrb[0].mxu0  ;;  %v834_v18 = vpop.f32.mrb[0].mxu1 }
 0x148   : > { %v445_v17 = vadd.f32 %v823_v16, %v778_v14  ;;  %v439_v19 = vpop.f32.mrb[1].mxu0  ;;  %v531_v20 = vadd.f32 %v834_v18, %v781_v15  ;;  %v525_v22 = vpop.f32.mrb[1].mxu1 }
 0x149   : > { %v440_v21 = vadd.f32 %v778_v14, %v439_v19  ;;  %v526_v23 = vadd.f32 %v781_v15, %v525_v22 }
 0x14a   : > { %536 = vst.msk [vmem:[%s1314_s18 + $0x8] sm:$0xff] %vm534_vm1, %v445_v17  ;;  %543 = vrot.lane.b32.xlu0 %v445_v17, %s1079_s17  ;;  %538 = vst.msk [vmem:[%s1319_s7 + $0x8] sm:$0xff] %vm534_vm1, %v531_v20  ;;  %554 = vrot.lane.b32.xlu1 %v531_v20, %s1079_s17 }
 0x14b   : > { %535 = vst.msk [vmem:[%s1314_s18] sm:$0xff] %vm534_vm1, %v440_v21  ;;  %537 = vst.msk [vmem:[%s1319_s7] sm:$0xff] %vm534_vm1, %v526_v23 }
 0x14e   : > { %541 = vrot.lane.b32.xlu0 %v440_v21, %s1079_s17  ;;  %563 = vrot.lane.b32.xlu1 %v445_v17, %s1080_s10 }
 0x152   : > { %561 = vrot.lane.b32.xlu0 %v440_v21, %s1080_s10  ;;  %572 = vrot.lane.b32.xlu1 %v531_v20, %s1080_s10 }
 0x156   : > { %570 = vrot.lane.b32.xlu0 %v526_v23, %s1080_s10  ;;  %581 = vrot.lane.b32.xlu1 %v445_v17, %s1081_s12 }
 0x15a   : > { %579 = vrot.lane.b32.xlu0 %v440_v21, %s1081_s12  ;;  %552 = vrot.lane.b32.xlu1 %v526_v23, %s1079_s17 }
 0x15e   : > { %588 = vrot.lane.b32.xlu0 %v526_v23, %s1081_s12  ;;  %590 = vrot.lane.b32.xlu1 %v531_v20, %s1081_s12 }
 0x1bc   : > { %v544_v24 = vpop.permute.xlu0 %543  ;;  %v555_v25 = vpop.permute.xlu1 %554 }
 0x1bd   : > { %785 = vst.msk [vmem:[%s1314_s18 + $0x18] sm:$0xff] %vm534_vm1, %v544_v24  ;;  %787 = vst.msk [vmem:[%s1319_s7 + $0x18] sm:$0xff] %vm534_vm1, %v555_v25 }
 0x1c0   : > { %v542_v26 = vpop.permute.xlu0 %541  ;;  %v564_v27 = vpop.permute.xlu1 %563 }
 0x1c1   : > { %784 = vst.msk [vmem:[%s1314_s18 + $0x10] sm:$0xff] %vm534_vm1, %v542_v26  ;;  %789 = vst.msk [vmem:[%s1314_s18 + $0x28] sm:$0xff] %vm534_vm1, %v564_v27 }
 0x1c4   : > { %v562_v28 = vpop.permute.xlu0 %561  ;;  %v573_v29 = vpop.permute.xlu1 %572 }
 0x1c5   : > { %788 = vst.msk [vmem:[%s1314_s18 + $0x20] sm:$0xff] %vm534_vm1, %v562_v28  ;;  %791 = vst.msk [vmem:[%s1319_s7 + $0x28] sm:$0xff] %vm534_vm1, %v573_v29 }
 0x1c8   : > { %v571_v30 = vpop.permute.xlu0 %570  ;;  %v582_v31 = vpop.permute.xlu1 %581 }
 0x1c9   : > { %790 = vst.msk [vmem:[%s1319_s7 + $0x20] sm:$0xff] %vm534_vm1, %v571_v30  ;;  %793 = vst.msk [vmem:[%s1314_s18 + $0x38] sm:$0xff] %vm534_vm1, %v582_v31 }
 0x1cc   : > { %v580_v32 = vpop.permute.xlu0 %579  ;;  %v553_v33 = vpop.permute.xlu1 %552 }
 0x1cd   : > { %792 = vst.msk [vmem:[%s1314_s18 + $0x30] sm:$0xff] %vm534_vm1, %v580_v32  ;;  %786 = vst.msk [vmem:[%s1319_s7 + $0x10] sm:$0xff] %vm534_vm1, %v553_v33 }
 0x1d0   : > { %v589_v34 = vpop.permute.xlu0 %588  ;;  %v591_v35 = vpop.permute.xlu1 %590 }
 0x1d1   : > { %794 = vst.msk [vmem:[%s1319_s7 + $0x30] sm:$0xff] %vm534_vm1, %v589_v34  ;;  %795 = vst.msk [vmem:[%s1319_s7 + $0x38] sm:$0xff] %vm534_vm1, %v591_v35 }
 0x1d2 PF: > { %s21_s26 = sadd.s32 1, %s1072_s26   ;;  %s1390_s21 = smov %s1056_s22 }
 0x1d3   : > { %p18_p9 = scmp.ge.s32.totalorder %s21_s26, 4   ;;  %s1391_s22 = smov %s1060_s23 }
 0x1d4   : > { %s1392_s23 = smov %s1239_s14  ;;  %s1393_s24 = smov %s1068_s25 }
 0x1d5   : > { %s1394_s25 = smov %s1396_s27  ;;  %20 = sbr.rel (!%p18_p9) target bundleno = 5 (0x5), region = 106 }
 0x1dc   :  { %652 = vsyncpa [#allocation3], 1 }
 0x1dd   :  { %654 = vsyncpa [#allocation3 + $0x1], 1 }
 0x1de   :  { %655 = vsyncpa [#allocation5], 1 }

</bundles_post_ra>
